<compile_context>
chip_gen: v7x
topology: tpu7x:2x2x1
jax: 0.10.0
libtpu: 0.0.40
codegen_flags: <defaults>
</compile_context>

<pallas_src>
import math
from functools import partial

import jax
import jax.numpy as jnp
from jax.experimental import pallas as pl
from jax.experimental.pallas import tpu as pltpu


def _round_up(x, m):
    return ((x + m - 1) // m) * m


def _vmem_limit(*nbytes):
    # 2x for double-buffering + headroom; never below the 32 MiB default so a
    # config that worked with defaults cannot regress (v5e default is 16 MiB,
    # so this explicitly raises it there as recommended).
    est = 2 * int(sum(int(b) for b in nbytes)) + (4 << 20)
    return int(min(max(est, 32 << 20), 112 << 20))


def _sigmoid(x):
    # explicit exp so it lowers to the EUP
    return 1.0 / (1.0 + jnp.exp(-x))


def _erf(x):
    # Abramowitz & Stegun 7.1.26 polynomial, max abs error ~1.5e-7.
    # TODO(synk): switch to tanh-approx GELU if VALU ever binds (review note).
    a1, a2, a3, a4, a5 = (0.254829592, -0.284496736, 1.421413741,
                          -1.453152027, 1.061405429)
    p = 0.3275911
    ax = jnp.abs(x)
    t = 1.0 / (1.0 + p * ax)
    poly = ((((a5 * t + a4) * t + a3) * t + a2) * t + a1) * t
    y = 1.0 - poly * jnp.exp(-ax * ax)
    return jnp.where(x >= 0, y, -y)


def _gelu_exact(x):
    return 0.5 * x * (1.0 + _erf(x * 0.7071067811865476))


# ---------------------------------------------------------------------------
# Kernel 1: row-tiled dense layer  y = x @ w + b   (optionally fused GELU)
#   x tile cast to bf16 in-kernel; weight passed resident in bf16.
# ---------------------------------------------------------------------------
def _linear_kernel(x_ref, w_ref, b_ref, o_ref, *, act):
    x = x_ref[...].astype(jnp.bfloat16)
    y = jnp.dot(x, w_ref[...], preferred_element_type=jnp.float32)
    y = y + b_ref[...]
    if act == "gelu":
        y = _gelu_exact(y)
    o_ref[...] = y.astype(o_ref.dtype)


def linear(x, w, b, act="none", block_rows=512):
    n, din = x.shape
    dout = w.shape[1]
    tm = n if n <= block_rows else block_rows
    grid = (pl.cdiv(n, tm),)
    w_bf = w.astype(jnp.bfloat16)           # resident weight, half VMEM
    # TODO(synk): for very large (din,dout) weights add a dout / K grid axis so
    # the resident weight fits v7x's 64 MiB VMEM; not needed at these sizes.
    vmem = _vmem_limit(2 * tm * (din + dout) * 4, din * dout * 2)
    return pl.pallas_call(
        partial(_linear_kernel, act=act),
        out_shape=jax.ShapeDtypeStruct((n, dout), jnp.float32),
        grid=grid,
        in_specs=[pl.BlockSpec((tm, din), lambda i: (i, 0)),
                  pl.BlockSpec((din, dout), lambda i: (0, 0)),
                  pl.BlockSpec((1, dout), lambda i: (0, 0))],
        out_specs=pl.BlockSpec((tm, dout), lambda i: (i, 0)),
        compiler_params=pltpu.CompilerParams(
            dimension_semantics=("parallel",),
            vmem_limit_bytes=vmem),
    )(x, w_bf, b)


# ---------------------------------------------------------------------------
# Kernel 2: fused per-relation kernel, tiled over edges.
#   For each edge tile: gather src/dst rows (one-hot x resident-block matmul,
#   bf16), per-head attention, weighted message, scatter-add into the
#   VMEM-resident (N_dst, hidden) accumulator (transposed contraction of the
#   same dst one-hot — no second selector).  The accumulator is initialised
#   from the running cross-relation aggregate at step 0 and aliased back out.
# ---------------------------------------------------------------------------
def _relation_kernel(agg_ref, q_ref, km_ref, src_ref, dst_ref, ew_ref,
                     selq_ref, selt_ref, o_ref, *, hidden):
    f32, bf16 = jnp.float32, jnp.bfloat16

    @pl.when(pl.program_id(0) == 0)
    def _():
        o_ref[...] = agg_ref[...]          # running cross-relation aggregate

    te = src_ref.shape[0]
    n_src = km_ref.shape[0]
    n_dst = q_ref.shape[0]

    # One-hot gather selectors for this edge tile (0/1 exact in bf16).
    # Padded edges carry index -1 -> all-zero rows -> contribute nothing.
    src_sel = (jax.lax.broadcasted_iota(jnp.int32, (te, n_src), 1)
               == src_ref[...]).astype(bf16)                       # (te, N_src)
    dst_sel = (jax.lax.broadcasted_iota(jnp.int32, (te, n_dst), 1)
               == dst_ref[...]).astype(bf16)                       # (te, N_dst)

    # Gather K|M and Q rows (bf16 MXU, f32 accumulate).
    km_e = jnp.dot(src_sel, km_ref[...], preferred_element_type=f32)  # (te,2h)
    q_e = jnp.dot(dst_sel, q_ref[...], preferred_element_type=f32)    # (te, h)
    k_e = km_e[:, :hidden]
    m_e = km_e[:, hidden:]

    # Per-head score; w_pri / sqrt(d_k) are folded into selq columns at init.
    # These two dots are tiny ((te,h)x(h,H) / (te,H)x(H,h)) -> kept f32.
    s = jnp.dot(q_e * k_e, selq_ref[...], preferred_element_type=f32)  # (te,H)
    score = _sigmoid(s) * ew_ref[...]                                  # (te,H)
    att = jnp.dot(score, selt_ref[...], preferred_element_type=f32)    # (te,h)
    msg = (m_e * att).astype(bf16)                                     # u_mul_e

    # Scatter-add over destinations: contract the edge axis of dst_sel itself.
    o_ref[...] += jax.lax.dot_general(
        dst_sel, msg, dimension_numbers=(((0,), (0,)), ((), ())),
        preferred_element_type=f32)


def relation_aggregate(agg, q_bf, km_bf, src_idx, dst_idx, edge_w,
                       selq, selt, hidden, edge_block=512):
    n_dst = q_bf.shape[0]
    n_src = km_bf.shape[0]
    n_heads = selq.shape[1]
    n_e = int(src_idx.shape[0])

    te = min(edge_block, _round_up(max(n_e, 1), 8))
    e_pad = _round_up(max(n_e, 1), te)

    def pad_col(x, fill, dtype):
        x = x.astype(dtype).reshape(-1, 1)
        if e_pad > n_e:
            x = jnp.pad(x, ((0, e_pad - n_e), (0, 0)), constant_values=fill)
        return x

    srcc = pad_col(src_idx, -1, jnp.int32)
    dstc = pad_col(dst_idx, -1, jnp.int32)
    ew = pad_col(edge_w, 0.0, jnp.float32)

    vmem = _vmem_limit(agg.nbytes * 2, q_bf.nbytes, km_bf.nbytes,
                       te * (n_src + n_dst) * 2, te * 4 * hidden * 4)
    return pl.pallas_call(
        partial(_relation_kernel, hidden=hidden),
        out_shape=jax.ShapeDtypeStruct((n_dst, hidden), jnp.float32),
        grid=(e_pad // te,),
        in_specs=[
            pl.BlockSpec((n_dst, hidden), lambda e: (0, 0)),        # agg (f32)
            pl.BlockSpec((n_dst, hidden), lambda e: (0, 0)),        # q  (bf16)
            pl.BlockSpec((n_src, 2 * hidden), lambda e: (0, 0)),    # km (bf16)
            pl.BlockSpec((te, 1), lambda e: (e, 0)),                # src idx
            pl.BlockSpec((te, 1), lambda e: (e, 0)),                # dst idx
            pl.BlockSpec((te, 1), lambda e: (e, 0)),                # edge w
            pl.BlockSpec((hidden, n_heads), lambda e: (0, 0)),      # selq
            pl.BlockSpec((n_heads, hidden), lambda e: (0, 0)),      # selt
        ],
        out_specs=pl.BlockSpec((n_dst, hidden), lambda e: (0, 0)),
        input_output_aliases={0: 0},        # accumulate into the running agg
        compiler_params=pltpu.CompilerParams(
            dimension_semantics=("arbitrary",),
            vmem_limit_bytes=vmem),
    )(agg, q_bf, km_bf, srcc, dstc, ew, selq, selt)


# ---------------------------------------------------------------------------
# Kernel 3: fused node update
#   t = agg * (1/n_rels); y = t @ Wa + ba;
#   out = LayerNorm( y * alpha + feat * (1 - alpha) ),  alpha via SMEM scalar.
# ---------------------------------------------------------------------------
def _update_kernel(t_ref, w_ref, b_ref, f_ref, g_ref, be_ref, alpha_ref, o_ref,
                   *, inv_nrels, eps):
    t = (t_ref[...] * inv_nrels).astype(jnp.bfloat16)    # cross_reducer='mean'
    y = jnp.dot(t, w_ref[...], preferred_element_type=jnp.float32) + b_ref[...]
    alpha = alpha_ref[0]                                 # SMEM scalar
    # TODO(synk): dropout(p=0.2) treated as identity (eval mode).
    z = y * alpha + f_ref[...] * (1.0 - alpha)
    mu = jnp.mean(z, axis=-1, keepdims=True)
    var = jnp.mean(jnp.square(z - mu), axis=-1, keepdims=True)
    o_ref[...] = (z - mu) * jax.lax.rsqrt(var + eps) * g_ref[...] + be_ref[...]


def update_node(t, w, b, feat, gamma, beta, alpha, inv_nrels,
                eps=1e-5, block_rows=512):
    n, hidden = t.shape
    tm = n if n <= block_rows else block_rows
    grid = (pl.cdiv(n, tm),)
    w_bf = w.astype(jnp.bfloat16)
    vmem = _vmem_limit(2 * tm * hidden * 4 * 3, hidden * hidden * 2)
    return pl.pallas_call(
        partial(_update_kernel, inv_nrels=inv_nrels, eps=eps),
        out_shape=jax.ShapeDtypeStruct((n, hidden), jnp.float32),
        grid=grid,
        in_specs=[pl.BlockSpec((tm, hidden), lambda i: (i, 0)),
                  pl.BlockSpec((hidden, hidden), lambda i: (0, 0)),
                  pl.BlockSpec((1, hidden), lambda i: (0, 0)),
                  pl.BlockSpec((tm, hidden), lambda i: (i, 0)),
                  pl.BlockSpec((1, hidden), lambda i: (0, 0)),
                  pl.BlockSpec((1, hidden), lambda i: (0, 0)),
                  pl.BlockSpec(memory_space=pltpu.MemorySpace.SMEM)],
        out_specs=pl.BlockSpec((tm, hidden), lambda i: (i, 0)),
        compiler_params=pltpu.CompilerParams(
            dimension_semantics=("parallel",),
            vmem_limit_bytes=vmem),
    )(t, w_bf, b, feat, gamma, beta, alpha)


# ---------------------------------------------------------------------------
# Parameter init (effective fused weights / scaled selectors hoisted here)
# ---------------------------------------------------------------------------
def _init_linear(key, din, dout):
    kw, kb = jax.random.split(key)
    lim = 1.0 / math.sqrt(din)
    w = jax.random.uniform(kw, (din, dout), jnp.float32, -lim, lim)
    b = jax.random.uniform(kb, (1, dout), jnp.float32, -lim, lim)
    return w, b


def _fold_headwise(w, b, w_head, num_heads, d_k):
    # (x @ w + b) viewed (-1, H, dk) then einsum('bij,ijk->bik', ., w_head)
    # == x @ w_eff + b_eff on the flat (H*dk) layout.
    hidden = num_heads * d_k
    w_eff = jnp.einsum('dhi,hij->dhj',
                       w.reshape(w.shape[0], num_heads, d_k),
                       w_head).reshape(w.shape[0], hidden)
    b_eff = jnp.einsum('hi,hij->hj',
                       b.reshape(num_heads, d_k),
                       w_head).reshape(1, hidden)
    return w_eff, b_eff


def init_hgt_params(key, meta_rels, node_dict, edge_dict, input_dim, hidden_dim,
                    output_dim, num_layers, num_heads):
    n_nt, n_et = len(node_dict), len(edge_dict)
    d_k = hidden_dim // num_heads
    inv_sqrt_dk = 1.0 / math.sqrt(d_k)
    params = {"adapt": [], "layers": [], "out": None}

    # hoisted head-selector constants for the relation kernel
    lane_head = jnp.arange(hidden_dim) // d_k
    head_sel = (lane_head[:, None] == jnp.arange(num_heads)[None, :]
                ).astype(jnp.float32)                 # (hidden, H)
    params["head_sel_t"] = head_sel.T                 # (H, hidden)

    key, *ks = jax.random.split(key, n_nt + 1)
    for t in range(n_nt):
        params["adapt"].append(_init_linear(ks[t], input_dim, hidden_dim))

    for _ in range(num_layers):
        lp = {"k": [], "q": [], "m": [], "a": [], "ln": []}
        for t in range(n_nt):
            key, k1, k2, k3, k4 = jax.random.split(key, 5)
            lp["k"].append(_init_linear(k1, hidden_dim, hidden_dim))
            lp["q"].append(_init_linear(k2, hidden_dim, hidden_dim))
            lp["m"].append(_init_linear(k3, hidden_dim, hidden_dim))
            lp["a"].append(_init_linear(k4, hidden_dim, hidden_dim))
            lp["ln"].append((jnp.ones((1, hidden_dim), jnp.float32),
                             jnp.zeros((1, hidden_dim), jnp.float32)))
        key, ka, km = jax.random.split(key, 3)
        xav = math.sqrt(6.0 / (d_k + d_k))
        lp["w_pri"] = jnp.ones((n_et, num_heads), jnp.float32)
        lp["w_att"] = jax.random.uniform(ka, (n_et, num_heads, d_k, d_k),
                                         jnp.float32, -xav, xav)
        lp["w_msg"] = jax.random.uniform(km, (n_et, num_heads, d_k, d_k),
                                         jnp.float32, -xav, xav)
        # NOTE: reference PyTorch allocates skip with shape (num_etypes,) and
        # indexes it by node-type id — reproduced verbatim (valid n_nt<=n_et).
        lp["skip"] = jnp.ones((n_et,), jnp.float32)

        # w_pri / sqrt(d_k) folded into the head-reduce selector (per etype).
        lp["selq"] = [head_sel * (lp["w_pri"][e] * inv_sqrt_dk)[None, :]
                      for e in range(n_et)]

        # Fold per-head w_att / w_msg into the K/M weights and fuse K & M into
        # one concatenated (hidden, 2*hidden) matmul — done once, hoisted.
        lp["km_eff"] = {}
        for (src_t, etype, _dst_t) in meta_rels:
            s_id, e_id = node_dict[src_t], edge_dict[etype]
            if (s_id, e_id) in lp["km_eff"]:
                continue
            wk_eff, bk_eff = _fold_headwise(*lp["k"][s_id], lp["w_att"][e_id],
                                            num_heads, d_k)
            wm_eff, bm_eff = _fold_headwise(*lp["m"][s_id], lp["w_msg"][e_id],
                                            num_heads, d_k)
            lp["km_eff"][(s_id, e_id)] = (
                jnp.concatenate([wk_eff, wm_eff], axis=1),
                jnp.concatenate([bk_eff, bm_eff], axis=1))
        params["layers"].append(lp)

    key, ko = jax.random.split(key)
    params["out"] = _init_linear(ko, hidden_dim, output_dim)
    return params


# ---------------------------------------------------------------------------
# HGT layer / model forward
# ---------------------------------------------------------------------------
def hgt_layer_forward(lp, graph, feat_dict, edge_weight_dict, num_heads, d_k,
                      head_sel_t):
    node_dict, edge_dict = graph["node_dict"], graph["edge_dict"]
    num_nodes = graph["num_nodes"]
    hidden = num_heads * d_k

    agg = {nt: jnp.zeros((num_nodes[nt], hidden), jnp.float32)
           for nt in node_dict}
    n_rels = {nt: 0 for nt in node_dict}
    q_cache, km_cache = {}, {}

    for meta_rel in graph["meta_rels"]:
        src_t, etype, dst_t = meta_rel
        s_id, d_id, e_id = node_dict[src_t], node_dict[dst_t], edge_dict[etype]
        src_idx, dst_idx = graph["edges"][meta_rel]

        # projections cached per dst type / per (src type, edge type); cached
        # as bf16 since the relation kernel is their only consumer.
        if dst_t not in q_cache:
            q_cache[dst_t] = linear(feat_dict[dst_t],
                                    *lp["q"][d_id]).astype(jnp.bfloat16)
        km_key = (s_id, e_id)
        if km_key not in km_cache:
            km_cache[km_key] = linear(feat_dict[src_t],
                                      *lp["km_eff"][km_key]).astype(jnp.bfloat16)

        agg[dst_t] = relation_aggregate(
            agg[dst_t], q_cache[dst_t], km_cache[km_key], src_idx, dst_idx,
            edge_weight_dict[meta_rel], lp["selq"][e_id], head_sel_t, hidden)
        n_rels[dst_t] += 1

    new_feat = {}
    for nt, n_id in node_dict.items():
        inv = 1.0 / float(max(n_rels[nt], 1))     # mean over incoming relations
        # sigmoid(skip) computed once on the scalar path (TPU scalar unit has
        # no transcendental); passed to the kernel through SMEM.
        alpha = jax.nn.sigmoid(lp["skip"][n_id]).reshape(1).astype(jnp.float32)
        new_feat[nt] = update_node(agg[nt], lp["a"][n_id][0], lp["a"][n_id][1],
                                   feat_dict[nt], lp["ln"][n_id][0],
                                   lp["ln"][n_id][1], alpha, inv)
    return new_feat


def hgt_forward(params, graph, feat_dict, edge_weight_dict, out_key,
                num_heads, d_k):
    node_dict = graph["node_dict"]
    h = {}
    for nt, n_id in node_dict.items():
        # adapt linear with fused exact-erf GELU (single kernel, no HBM bounce)
        h[nt] = linear(feat_dict[nt], *params["adapt"][n_id], act="gelu")
    for lp in params["layers"]:
        h = hgt_layer_forward(lp, graph, h, edge_weight_dict, num_heads, d_k,
                              params["head_sel_t"])
    return (linear(h[out_key], *params["out"]),)


# ---------------------------------------------------------------------------
if __name__ == "__main__":
    meta_rels = [("author", "writes", "paper"),
                 ("paper", "written_by", "author"),
                 ("paper", "cites", "paper")]
    ntypes = sorted(set([r[0] for r in meta_rels] + [r[2] for r in meta_rels]))
    etypes = sorted(set(r[1] for r in meta_rels))
    node_dict = {nt: i for i, nt in enumerate(ntypes)}
    edge_dict = {et: i for i, et in enumerate(etypes)}

    num_nodes = {"author": 6, "paper": 10}
    input_dim, hidden_dim, output_dim = 16, 32, 8
    num_layers, num_heads = 2, 4
    d_k = hidden_dim // num_heads
    n_edges = 12

    key = jax.random.PRNGKey(0)
    key, kf, ke, kp = jax.random.split(key, 4)

    # synthetic heterogeneous graph (deterministic)
    edges, edge_weight_dict = {}, {}
    for i, mr in enumerate(meta_rels):
        src_t, _, dst_t = mr
        k1, k2, k3 = jax.random.split(jax.random.fold_in(ke, i), 3)
        src_idx = jax.random.randint(k1, (n_edges,), 0, num_nodes[src_t])
        dst_idx = jax.random.randint(k2, (n_edges,), 0, num_nodes[dst_t])
        edges[mr] = (src_idx, dst_idx)
        edge_weight_dict[mr] = jax.random.uniform(k3, (n_edges,), jnp.float32)

    graph = {"meta_rels": meta_rels, "node_dict": node_dict,
             "edge_dict": edge_dict, "num_nodes": num_nodes, "edges": edges}

    feat_dict = {
        nt: jax.random.normal(jax.random.fold_in(kf, i),
                              (num_nodes[nt], input_dim), jnp.float32)
        for i, nt in enumerate(ntypes)
    }

    params = init_hgt_params(kp, meta_rels, node_dict, edge_dict, input_dim,
                             hidden_dim, output_dim, num_layers, num_heads)

    (out,) = hgt_forward(params, graph, feat_dict, edge_weight_dict,
                         out_key="paper", num_heads=num_heads, d_k=d_k)
    out = jax.block_until_ready(out)
    assert out.shape == (num_nodes["paper"], output_dim)
    assert bool(jnp.all(jnp.isfinite(out)))
    print("KERNEL_OK")
</pallas_src>

<mosaic_0001>
module attributes {stable_mosaic.version = 11 : i64} {
  func.func @_linear_kernel(%arg0: i32, %arg1: memref<6x16xf32, #tpu.memory_space<vmem>>, %arg2: memref<16x32xbf16, #tpu.memory_space<vmem>>, %arg3: memref<1x32xf32, #tpu.memory_space<vmem>>, %arg4: memref<6x32xf32, #tpu.memory_space<vmem>>) attributes {dimension_semantics = [#tpu.dimension_semantics<parallel>], iteration_bounds = array<i64: 1>, scalar_prefetch = 0 : i64, scratch_operands = 0 : i64, tpu.core_type = #tpu.core_type<tc>, window_params = [{transform_indices = @transform_0, window_bounds = array<i64: 6, 16>}, {pipeline_mode = #tpu.pipeline_mode<synchronous>, transform_indices = @transform_1, window_bounds = array<i64: 16, 32>}, {pipeline_mode = #tpu.pipeline_mode<synchronous>, transform_indices = @transform_2, window_bounds = array<i64: 1, 32>}, {transform_indices = @transform_3, window_bounds = array<i64: 6, 32>}]} {
    %c0 = arith.constant 0 : index
    %c0_0 = arith.constant 0 : index
    %0 = vector.load %arg1[%c0, %c0_0] : memref<6x16xf32, #tpu.memory_space<vmem>>, vector<6x16xf32>
    %1 = arith.truncf %0 : vector<6x16xf32> to vector<6x16xbf16>
    %c0_1 = arith.constant 0 : index
    %c0_2 = arith.constant 0 : index
    %2 = vector.load %arg2[%c0_1, %c0_2] : memref<16x32xbf16, #tpu.memory_space<vmem>>, vector<16x32xbf16>
    %cst = arith.constant dense<0.000000e+00> : vector<6x32xf32>
    %3 = tpu.matmul %1, %2, %cst {dimension_numbers = #tpu.dot_dimension_numbers<[1], [0], [0], [1], [0, 0, 1, 1], [], []>} : vector<6x16xbf16>, vector<16x32xbf16>, vector<6x32xf32> -> vector<6x32xf32>
    %c0_3 = arith.constant 0 : index
    %c0_4 = arith.constant 0 : index
    %4 = vector.load %arg3[%c0_3, %c0_4] : memref<1x32xf32, #tpu.memory_space<vmem>>, vector<1x32xf32>
    %5 = vector.broadcast %4 : vector<1x32xf32> to vector<6x32xf32>
    %6 = arith.addf %3, %5 : vector<6x32xf32>
    %cst_5 = arith.constant 5.000000e-01 : f32
    %7 = vector.broadcast %cst_5 : f32 to vector<6x32xf32>
    %8 = arith.mulf %7, %6 : vector<6x32xf32>
    %cst_6 = arith.constant 0.707106769 : f32
    %9 = vector.broadcast %cst_6 : f32 to vector<6x32xf32>
    %10 = arith.mulf %6, %9 : vector<6x32xf32>
    %11 = math.absf %10 : vector<6x32xf32>
    %cst_7 = arith.constant 0.327591091 : f32
    %12 = vector.broadcast %cst_7 : f32 to vector<6x32xf32>
    %13 = arith.mulf %12, %11 : vector<6x32xf32>
    %cst_8 = arith.constant 1.000000e+00 : f32
    %14 = vector.broadcast %cst_8 : f32 to vector<6x32xf32>
    %15 = arith.addf %14, %13 : vector<6x32xf32>
    %cst_9 = arith.constant 1.000000e+00 : f32
    %16 = vector.broadcast %cst_9 : f32 to vector<6x32xf32>
    %17 = arith.divf %16, %15 : vector<6x32xf32>
    %cst_10 = arith.constant 1.06140542 : f32
    %18 = vector.broadcast %cst_10 : f32 to vector<6x32xf32>
    %19 = arith.mulf %18, %17 : vector<6x32xf32>
    %cst_11 = arith.constant -1.45315206 : f32
    %20 = vector.broadcast %cst_11 : f32 to vector<6x32xf32>
    %21 = arith.addf %19, %20 : vector<6x32xf32>
    %22 = arith.mulf %21, %17 : vector<6x32xf32>
    %cst_12 = arith.constant 1.42141378 : f32
    %23 = vector.broadcast %cst_12 : f32 to vector<6x32xf32>
    %24 = arith.addf %22, %23 : vector<6x32xf32>
    %25 = arith.mulf %24, %17 : vector<6x32xf32>
    %cst_13 = arith.constant -0.284496725 : f32
    %26 = vector.broadcast %cst_13 : f32 to vector<6x32xf32>
    %27 = arith.addf %25, %26 : vector<6x32xf32>
    %28 = arith.mulf %27, %17 : vector<6x32xf32>
    %cst_14 = arith.constant 0.254829586 : f32
    %29 = vector.broadcast %cst_14 : f32 to vector<6x32xf32>
    %30 = arith.addf %28, %29 : vector<6x32xf32>
    %31 = arith.mulf %30, %17 : vector<6x32xf32>
    %cst_15 = arith.constant 0.000000e+00 : f32
    %32 = vector.broadcast %cst_15 : f32 to vector<6x32xf32>
    %33 = arith.subf %32, %11 : vector<6x32xf32>
    %34 = arith.mulf %33, %11 : vector<6x32xf32>
    %35 = math.exp %34 : vector<6x32xf32>
    %36 = arith.mulf %31, %35 : vector<6x32xf32>
    %cst_16 = arith.constant 1.000000e+00 : f32
    %37 = vector.broadcast %cst_16 : f32 to vector<6x32xf32>
    %38 = arith.subf %37, %36 : vector<6x32xf32>
    %cst_17 = arith.constant 0.000000e+00 : f32
    %39 = vector.broadcast %cst_17 : f32 to vector<6x32xf32>
    %40 = arith.cmpf oge, %10, %39 : vector<6x32xf32>
    %cst_18 = arith.constant 0.000000e+00 : f32
    %41 = vector.broadcast %cst_18 : f32 to vector<6x32xf32>
    %42 = arith.subf %41, %38 : vector<6x32xf32>
    %43 = arith.select %40, %38, %42 : vector<6x32xi1>, vector<6x32xf32>
    %cst_19 = arith.constant 1.000000e+00 : f32
    %44 = vector.broadcast %cst_19 : f32 to vector<6x32xf32>
    %45 = arith.addf %44, %43 : vector<6x32xf32>
    %46 = arith.mulf %8, %45 : vector<6x32xf32>
    %c0_20 = arith.constant 0 : index
    %c0_21 = arith.constant 0 : index
    %47 = vector.load %arg4[%c0_20, %c0_21] : memref<6x32xf32, #tpu.memory_space<vmem>>, vector<6x32xf32>
    tpu.vector_store %arg4[%c0_20, %c0_21], %46 {strides = array<i32>} : memref<6x32xf32, #tpu.memory_space<vmem>>, vector<6x32xf32>,
    return
  }
  func.func @transform_0(%arg0: i32) -> (i32, i32) {
    %c0_i32 = arith.constant 0 : i32
    %c0_i32_0 = arith.constant 0 : i32
    return %arg0, %c0_i32 : i32, i32
  }
  func.func @transform_1(%arg0: i32) -> (i32, i32) {
    %c0_i32 = arith.constant 0 : i32
    %c0_i32_0 = arith.constant 0 : i32
    %c0_i32_1 = arith.constant 0 : i32
    return %c0_i32, %c0_i32_0 : i32, i32
  }
  func.func @transform_2(%arg0: i32) -> (i32, i32) {
    %c0_i32 = arith.constant 0 : i32
    %c0_i32_0 = arith.constant 0 : i32
    %c0_i32_1 = arith.constant 0 : i32
    return %c0_i32, %c0_i32_0 : i32, i32
  }
  func.func @transform_3(%arg0: i32) -> (i32, i32) {
    %c0_i32 = arith.constant 0 : i32
    %c0_i32_0 = arith.constant 0 : i32
    return %arg0, %c0_i32 : i32, i32
  }
}

</mosaic_0001>

<bundles_post_ra>
// kernel: tpu_custom_call.1
= control target key start
LH: loop header
LB: loop body
LE: loop exit
PB: predicated region body
PF: predicated region fallthrough
CT: control target
= control target key end

     0   :  { %8 = vsyncpa [#allocation3], 0  ;;  %s316_s0 = inlined_call_operand.hbm [shape: f32[6,16], index: 0, kind: input, shape index: {}]   ;;  %s317_s1 = inlined_call_operand.hbm [shape: bf16[16,32], index: 1, kind: input, shape index: {}]   ;;  %s318_s2 = inlined_call_operand.vmem [shape: f32[1,32], index: 2, kind: input, shape index: {}]   ;;  %s319_s3 = inlined_call_operand.hbm [shape: f32[6,32], index: 3, kind: output, shape index: {}]  }
   0x1   :  { %9 = vsyncpa [#allocation6], 0 }
   0x2   :  { %10 = vsyncpa [#allocation4], 0  ;;  %s243_s12 = smov [#allocation2]   ;;  %s244_s14 = smov [#allocation5]  }
   0x3   :  { %s17_s13 = sshll.u32 %s243_s12, 4  ;;  %s26_s15 = sshll.u32 %s244_s14, 4  ;;  %s18_s13 = int_to_ptr.vmem [resolvable:$true] %s17_s13  ;;  %s270_s15 = int_to_ptr.vmem [resolvable:$true] %s26_s15 }
   0x4   :  { %s171_s18 = scalar_lea.hbm %s316_s0, 128 }
   0x5   :  { %p172_p0 = scmp.ne.s32.totalorder %s316_s0, %s171_s18  ;;  %p175_p1 = scmp.lt.u32.totalorder %s171_s18, %s316_s0 }
   0x7   :  { %p177_p2 = pnand %p175_p1, %p172_p0 }
   0x9   :  { %180 = shalt.err (!%p177_p2)
}
   0xa   :  { %s181_s23 = scalar_lea.vmem %s18_s13, 128  ;;  %p186_p4 = scmp.lt.s32.totalorder %s18_s13, %s18_s13 }
   0xb   :  { %p182_p3 = scmp.ne.s32.totalorder %s18_s13, %s181_s23  ;;  %p187_p5 = scmp.lt.s32.totalorder %s181_s23, %s181_s23 }
   0xd   :  { %p188_p6 = por %p187_p5, %p186_p4 }
   0xf   :  { %p189_p7 = pnand %p188_p6, %p182_p3 }
  0x11   :  { %192 = shalt.err (!%p189_p7)
}
  0x12   :  { %20 = dma.hbm_to_vmem [thread:$0]  %s316_s0, 128, %s18_s13, [#allocation3]  }
  0x13   :  { %s193_s28 = scalar_lea.hbm %s317_s1, 128 }
  0x14   :  { %p194_p8 = scmp.ne.s32.totalorder %s317_s1, %s193_s28  ;;  %p197_p9 = scmp.lt.u32.totalorder %s193_s28, %s317_s1 }
  0x16   :  { %p199_p10 = pnand %p197_p9, %p194_p8 }
  0x18   :  { %202 = shalt.err (!%p199_p10)
}
  0x19   :  { %s203_s6 = scalar_lea.vmem %s270_s15, 128  ;;  %p208_p12 = scmp.lt.s32.totalorder %s270_s15, %s270_s15 }
  0x1a   :  { %p204_p11 = scmp.ne.s32.totalorder %s270_s15, %s203_s6  ;;  %p209_p13 = scmp.lt.s32.totalorder %s203_s6, %s203_s6 }
  0x1c   :  { %p210_p0 = por %p209_p13, %p208_p12 }
  0x1e   :  { %p211_p1 = pnand %p210_p0, %p204_p11 }
  0x20   :  { %214 = shalt.err (!%p211_p1)
}
  0x21   :  { %s245_s0 = smov 64   ;;  %s246_s7 = smov 4  }
  0x22   :  { %32 = dma.hbm_to_vmem [thread:$0]  %s317_s1, 128, %s270_s15, [#allocation6], %s245_s0, %s245_s0, %s246_s7  }
  0x23   :  { %237 = dma.done.wait [#allocation3], 128  }
  0x24   :  { %238 = vsyncadd [#allocation3], 4294967168 }
  0x25   :  { %239 = dma.done.wait [#allocation6], 128  }
  0x26   :  { %240 = vsyncadd [#allocation6], 4294967168  ;;  %v247_v0 = vmov 0.0   ;;  %vm248_vm0 = vmmov 0   ;;  %v166_v1 = vld [vmem:[#allocation5] sm:$0xff]   ;;  %vm59_vm1 = vcmask 130048  }
  0x27   :  { %153 = vmatprep.subr.bf16.mxu0 %v247_v0  ;;  %155 = vmatprep.mubr.msk.bf16.mxu0 %vm248_vm0, %v247_v0  ;;  %v42_v2 = vld [vmem:[#allocation2] sm:$0x3f]  ;;  %s249_s1 = smov [#allocation7]   ;;  %vm130_vm3 = vcmask 259072  }
  0x28   :  { %154 = vmatpush3.bf16.msra.mxu0 %v166_v1  ;;  %v43_v3 = vpack.c.bf16 %v42_v2, %v42_v2  ;;  %v148_v4 = vld [vmem:[%s318_s2] ss:$0 sm:$0xff]  ;;  %s138_s2 = sshll.u32 %s249_s1, 4  ;;  %s139_s2 = int_to_ptr.vmem [resolvable:$true] %s138_s2 }
  0x29   :  { %s215_s12 = scalar_lea.vmem %s139_s2, 128  ;;  %p220_p3 = scmp.lt.s32.totalorder %s139_s2, %s139_s2 }
  0x2a   :  { %p216_p2 = scmp.ne.s32.totalorder %s139_s2, %s215_s12  ;;  %p221_p4 = scmp.lt.s32.totalorder %s215_s12, %s215_s12 }
  0x2b   :  { %156 = vmatmul.mubr.msk.bf16.vlgmr.msra.gmra.mrb[0].mxu0 %vm59_vm1, %v43_v3 }
  0x2c   :  { %p222_p5 = por %p221_p4, %p220_p3 }
  0x2e   :  { %p223_p6 = pnand %p222_p5, %p216_p2 }
  0xfe   :  { %v97_v5 = vpop.f32.mrb[0].mxu0 }
  0xff   :  { %v98_v6 = vadd.f32 %v148_v4, %v97_v5  ;;  %v157_v7 = vpop.f32.mrb[1].mxu0 }
 0x100   :  { %v100_v8 = vpop.f32.mrb[2].mxu0 }
 0x101   :  { %v104_v9 = vmul.f32 0.70710677, %v98_v6  ;;  %v158_v10 = vpop.f32.mrb[3].mxu0  ;;  %v103_v32 = vmul.f32 0.5, %v98_v6 }
 0x103   :  { %v105_v11 = vand.u32 2147483647, %v104_v9  ;;  %vm125_vm2 = vcmp.ge.f32.partialorder %v104_v9, 0.0 }
 0x105   :  { %v106_v12 = vmul.f32 0.3275911, %v105_v11  ;;  %v119_v14 = vsub.f32 0.0, %v105_v11 }
 0x107   :  { %v107_v13 = vadd.f32 1.0, %v106_v12  ;;  %v120_v16 = vmul.f32 %v119_v14, %v105_v11 }
 0x109   :  { %167 = vrcp.f32 %v107_v13  ;;  %v121_v19 = vmul.f32 1.442695, %v120_v16 }
 0x10b   :  { %169 = vpow2.f32 %v121_v19 }
 0x113   :  { %v168_v15 = vpop.eup %167 }
 0x114   :  { %v110_v17 = vmul.f32 1.0614054, %v168_v15 }
 0x115   :  { %v170_v27 = vpop.eup %169 }
 0x116   :  { %v111_v18 = vadd.f32 -1.4531521, %v110_v17 }
 0x118   :  { %v112_v20 = vmul.f32 %v168_v15, %v111_v18 }
 0x11a   :  { %v113_v21 = vadd.f32 1.4214138, %v112_v20 }
 0x11c   :  { %v114_v22 = vmul.f32 %v168_v15, %v113_v21 }
 0x11e   :  { %v115_v23 = vadd.f32 -0.28449672, %v114_v22 }
 0x120   :  { %v116_v24 = vmul.f32 %v168_v15, %v115_v23 }
 0x122   :  { %v117_v25 = vadd.f32 0.2548296, %v116_v24 }
 0x124   :  { %v118_v26 = vmul.f32 %v168_v15, %v117_v25 }
 0x126   :  { %v123_v28 = vmul.f32 %v170_v27, %v118_v26 }
 0x128   :  { %v124_v29 = vsub.f32 1.0, %v123_v28 }
 0x12a   :  { %v126_v30 = vsub.f32 0.0, %v124_v29 }
 0x12c   :  { %v127_v31 = vsel %vm125_vm2, %v124_v29, %v126_v30 }
 0x12d   :  { %v128_v33 = vadd.f32 1.0, %v127_v31 }
 0x12f   :  { %v129_v34 = vmul.f32 %v128_v33, %v103_v32 }
 0x131   :  { %131 = vst.msk [vmem:[#allocation7] sm:$0x3f] %vm130_vm3, %v129_v34 }
 0x132   :  { %226 = shalt.err (!%p223_p6)
}
 0x133   :  { %s227_s15 = scalar_lea.hbm %s319_s3, 128 }
 0x134   :  { %p228_p7 = scmp.ne.s32.totalorder %s319_s3, %s227_s15  ;;  %p231_p8 = scmp.lt.u32.totalorder %s227_s15, %s319_s3 }
 0x136   :  { %p233_p9 = pnand %p231_p8, %p228_p7 }
 0x138   :  { %236 = shalt.err (!%p233_p9)
}
 0x139   :  { %141 = dma.vmem_to_hbm [thread:$0]  %s139_s2, 128, %s319_s3, [#allocation4]  }
 0x13a   :  { %241 = dma.done.wait [#allocation4], 128  }
 0x13b   :  { %242 = vsyncadd [#allocation4], 4294967168 }
 0x13c   :  { %145 = vsyncpa [#allocation3], 1 }
 0x13d   :  { %146 = vsyncpa [#allocation6], 1 }
 0x13e   :  { %147 = vsyncpa [#allocation4], 1 }

</bundles_post_ra>
